<compile_context>
chip_gen: v6e
topology: v6e:2x2x1
jax: 0.10.0
libtpu: 0.0.40
codegen_flags: <defaults>
</compile_context>

<pallas_src>
from functools import partial

import jax
import jax.numpy as jnp
import numpy as np
from jax.experimental import pallas as pl
from jax.experimental.pallas import tpu as pltpu


def _distill_kernel(logits_ref, labels_ref, teacher_ref, out_ref, *,
                    inv_T, n_valid_rows, tile_n):
    # logits_ref / teacher_ref: (tile_n, C) native dtype; labels_ref: (tile_n, 1) i32.
    pid = pl.program_id(0)

    logits = logits_ref[...].astype(jnp.float32)     # (TN, C)
    teacher = teacher_ref[...].astype(jnp.float32)   # (TN, C)
    labels = labels_ref[...]                         # (TN, 1) i32

    tn, c = logits.shape

    # Rows past the true N (ragged last tile — no wrapper padding) hold garbage;
    # mask with jnp.where so Inf/NaN in garbage rows cannot survive.
    row_idx = pid * tile_n + jax.lax.broadcasted_iota(jnp.int32, (tn, 1), 0)
    row_valid = row_idx < n_valid_rows               # (TN, 1) bool

    # ---- student log-softmax pieces (only what is actually needed) -----------
    s_max = jnp.max(logits, axis=-1, keepdims=True)
    s_shift = logits - s_max                         # (TN, C)
    s_sum = jnp.sum(jnp.exp(s_shift), axis=-1, keepdims=True)
    s_lse = jnp.log(s_sum)                           # (TN, 1)

    # ---- teacher: fold 1/T into the shift; skip the multiply when T == 1 -----
    t_max = jnp.max(teacher, axis=-1, keepdims=True)
    t_shift = teacher - t_max
    if inv_T != 1.0:                                 # static Python constant
        t_shift = t_shift * inv_T
    exp_t = jnp.exp(t_shift)                         # (TN, C), reused twice
    t_sum = jnp.sum(exp_t, axis=-1, keepdims=True)
    t_lse = jnp.log(t_sum)

    # ---- KLDivLoss(log_target=True): sum p_t * (log p_t - log p_s), row-wise --
    # Restructured: kl_row = (1/t_sum) * sum(exp_t * (t_shift - s_shift)) + (s_lse - t_lse)
    kl_inner = jnp.sum(exp_t * (t_shift - s_shift), axis=-1, keepdims=True)
    kl_row = kl_inner * (1.0 / t_sum) + (s_lse - t_lse)        # (TN, 1)
    kl_sum = jnp.sum(jnp.where(row_valid, kl_row, 0.0))

    # ---- CrossEntropyLoss(reduction='mean', ignore_index=-100) ---------------
    # Gather the label entry from s_shift:  ce_row = s_lse - s_shift[row, label]
    col = jax.lax.broadcasted_iota(jnp.int32, (tn, c), 1)
    label_shift = jnp.sum(jnp.where(col == labels, s_shift, 0.0),
                          axis=-1, keepdims=True)              # (TN, 1)
    ce_row = s_lse - label_shift
    ce_valid = jnp.logical_and(row_valid, labels != -100)
    ce_sum = jnp.sum(jnp.where(ce_valid, ce_row, 0.0))
    ce_cnt = jnp.sum(ce_valid.astype(jnp.float32))

    # ---- lane-dense per-tile partials: lane0=CE sum, lane1=KL sum, lane2=count
    lane = jax.lax.broadcasted_iota(jnp.int32, (1, 8, 128), 2)
    out_ref[...] = jnp.where(lane == 0, ce_sum,
                             jnp.where(lane == 1, kl_sum,
                                       jnp.where(lane == 2, ce_cnt, 0.0)))


_VMEM_TILE_BUDGET = 40 * 1024 * 1024   # per-tile working-set budget (safe on v7x's 64 MiB)
_VMEM_LIMIT_BYTES = 48 * 1024 * 1024   # scoped VMEM limit passed to Mosaic (OK on v5e/v6e/v7x)


def _pick_tile_n(N, C, in_itemsize_sum):
    # per-row VMEM ~ 2 double-buffered input streams + ~4 live f32 (TN, C) temporaries
    bytes_per_row = C * (2 * in_itemsize_sum + 4 * 4) + 16
    tile_n = _VMEM_TILE_BUDGET // max(bytes_per_row, 1)
    tile_n = (tile_n // 8) * 8
    tile_n = max(8, min(int(tile_n), 1024))      # small C -> big tiles amortize grid overhead
    tile_n = min(tile_n, ((N + 7) // 8) * 8)     # never bigger than the 8-rounded row count
    return int(tile_n)


def distillation_loss(logits, labels, teacher_logits, T=1.0, a=0.5):
    """Pallas TPU implementation of DistillationLoss.forward.

    logits, teacher_logits: (B, S, C); labels: (B, S) int. Returns scalar f32.
    """
    B, S, C = logits.shape
    N = B * S

    # Keep native dtype on the wire (bf16 stays bf16); cast happens in-kernel.
    logits2d = logits.reshape(N, C)
    teacher2d = teacher_logits.reshape(N, C)
    labels2d = labels.reshape(N, 1).astype(jnp.int32)

    in_itemsize_sum = logits2d.dtype.itemsize + teacher2d.dtype.itemsize
    tile_n = _pick_tile_n(N, C, in_itemsize_sum)
    num_tiles = pl.cdiv(N, tile_n)

    # Deeper buffering only when a huge C forces tiny row tiles (per-step DMA
    # latency would otherwise be exposed). Never triggers for small shapes.
    big_spec_kwargs = {}
    if C >= 16384 and tile_n <= 64 and hasattr(pl, "Buffered"):
        big_spec_kwargs = {"pipeline_mode": pl.Buffered(3)}

    kernel = partial(_distill_kernel, inv_T=1.0 / float(T),
                     n_valid_rows=N, tile_n=tile_n)

    in_bytes = N * C * in_itemsize_sum + N * labels2d.dtype.itemsize
    out_bytes = num_tiles * 8 * 128 * 4

    partials = pl.pallas_call(
        kernel,
        out_shape=jax.ShapeDtypeStruct((num_tiles, 8, 128), jnp.float32),
        grid=(num_tiles,),
        in_specs=[
            pl.BlockSpec((tile_n, C), lambda i: (i, 0), **big_spec_kwargs),
            pl.BlockSpec((tile_n, 1), lambda i: (i, 0)),
            pl.BlockSpec((tile_n, C), lambda i: (i, 0), **big_spec_kwargs),
        ],
        out_specs=pl.BlockSpec((1, 8, 128), lambda i: (i, 0, 0)),
        compiler_params=pltpu.CompilerParams(
            dimension_semantics=("parallel",),
            vmem_limit_bytes=_VMEM_LIMIT_BYTES,
        ),
        cost_estimate=pl.CostEstimate(
            flops=12 * N * C,
            transcendentals=2 * N * C,
            bytes_accessed=in_bytes + out_bytes,
        ),
    )(logits2d, labels2d, teacher2d)

    ce_sum = jnp.sum(partials[:, 0, 0])
    kl_sum = jnp.sum(partials[:, 0, 1])
    ce_cnt = jnp.sum(partials[:, 0, 2])

    first_loss = ce_sum / jnp.maximum(ce_cnt, 1.0)   # CE 'mean' (ignore-aware)
    second_loss = kl_sum / float(B)                  # KLDiv 'batchmean'
    return a * first_loss + (1.0 - a) * second_loss


def _reference(logits, labels, teacher_logits, T=1.0, a=0.5):
    # Pure-JAX reference reproducing the PyTorch module's forward semantics.
    B, S, C = logits.shape
    t_logp = jax.nn.log_softmax(teacher_logits / T, axis=-1)
    s_logp = jax.nn.log_softmax(logits, axis=-1)
    onehot = jax.nn.one_hot(labels, C, dtype=jnp.float32)
    ce = -jnp.sum(onehot * s_logp, axis=-1)          # (B, S)
    first = jnp.mean(ce)                             # CrossEntropy 'mean'
    second = jnp.sum(jnp.exp(t_logp) * (t_logp - s_logp)) / B   # KLDiv 'batchmean'
    return a * first + (1 - a) * second


if __name__ == "__main__":
    key = jax.random.PRNGKey(0)
    k1, k2, k3 = jax.random.split(key, 3)

    B, S, C = 2, 8, 32
    T, a = 2.0, 0.5

    logits = jax.random.normal(k1, (B, S, C), dtype=jnp.float32)
    teacher_logits = jax.random.normal(k2, (B, S, C), dtype=jnp.float32)
    labels = jax.random.randint(k3, (B, S), 0, C, dtype=jnp.int32)

    loss = distillation_loss(logits, labels, teacher_logits, T=T, a=a)
    loss = jax.block_until_ready(loss)

    ref = _reference(logits, labels, teacher_logits, T=T, a=a)
    assert np.allclose(np.asarray(loss), np.asarray(ref), rtol=1e-5, atol=1e-5), (
        float(loss), float(ref))

    print("KERNEL_OK")
</pallas_src>

<mosaic_0001>
module attributes {stable_mosaic.version = 11 : i64} {
  func.func @_distill_kernel(%arg0: i32, %arg1: memref<16x32xf32, #tpu.memory_space<vmem>>, %arg2: memref<16x1xi32, #tpu.memory_space<vmem>>, %arg3: memref<16x32xf32, #tpu.memory_space<vmem>>, %arg4: memref<1x8x128xf32, #tpu.memory_space<vmem>>) attributes {dimension_semantics = [#tpu.dimension_semantics<parallel>], iteration_bounds = array<i64: 1>, scalar_prefetch = 0 : i64, scratch_operands = 0 : i64, tpu.core_type = #tpu.core_type<tc>, window_params = [{transform_indices = @transform_0, window_bounds = array<i64: 16, 32>}, {transform_indices = @transform_1, window_bounds = array<i64: 16, 1>}, {transform_indices = @transform_2, window_bounds = array<i64: 16, 32>}, {transform_indices = @transform_3, window_bounds = array<i64: 1, 8, 128>}]} {
    %c0 = arith.constant 0 : index
    %c0_0 = arith.constant 0 : index
    %0 = vector.load %arg1[%c0, %c0_0] : memref<16x32xf32, #tpu.memory_space<vmem>>, vector<16x32xf32>
    %c0_1 = arith.constant 0 : index
    %c0_2 = arith.constant 0 : index
    %1 = vector.load %arg3[%c0_1, %c0_2] : memref<16x32xf32, #tpu.memory_space<vmem>>, vector<16x32xf32>
    %c0_3 = arith.constant 0 : index
    %c0_4 = arith.constant 0 : index
    %2 = vector.load %arg2[%c0_3, %c0_4] : memref<16x1xi32, #tpu.memory_space<vmem>>, vector<16x1xi32>
    %c16_i32 = arith.constant 16 : i32
    %3 = arith.muli %arg0, %c16_i32 : i32
    %4 = tpu.iota {dimensions = array<i32: 0>} : vector<16x1xi32>
    %5 = vector.broadcast %3 : i32 to vector<16x1xi32>
    %6 = arith.addi %5, %4 : vector<16x1xi32>
    %c16_i32_5 = arith.constant 16 : i32
    %7 = vector.broadcast %c16_i32_5 : i32 to vector<16x1xi32>
    %8 = arith.cmpi slt, %6, %7 : vector<16x1xi32>
    %cst = arith.constant dense<0xFF800000> : vector<16xf32>
    %9 = vector.multi_reduction <maximumf>, %0, %cst [1] : vector<16x32xf32> to vector<16xf32>
    %10 = vector.shape_cast %9 : vector<16xf32> to vector<16x1xf32>
    %11 = vector.broadcast %10 : vector<16x1xf32> to vector<16x32xf32>
    %12 = arith.subf %0, %11 : vector<16x32xf32>
    %13 = math.exp %12 : vector<16x32xf32>
    %cst_6 = arith.constant dense<0.000000e+00> : vector<16xf32>
    %14 = vector.multi_reduction <add>, %13, %cst_6 [1] : vector<16x32xf32> to vector<16xf32>
    %15 = vector.shape_cast %14 : vector<16xf32> to vector<16x1xf32>
    %16 = math.log %15 : vector<16x1xf32>
    %cst_7 = arith.constant dense<0xFF800000> : vector<16xf32>
    %17 = vector.multi_reduction <maximumf>, %1, %cst_7 [1] : vector<16x32xf32> to vector<16xf32>
    %18 = vector.shape_cast %17 : vector<16xf32> to vector<16x1xf32>
    %19 = vector.broadcast %18 : vector<16x1xf32> to vector<16x32xf32>
    %20 = arith.subf %1, %19 : vector<16x32xf32>
    %cst_8 = arith.constant 5.000000e-01 : f32
    %21 = vector.broadcast %cst_8 : f32 to vector<16x32xf32>
    %22 = arith.mulf %20, %21 : vector<16x32xf32>
    %23 = math.exp %22 : vector<16x32xf32>
    %cst_9 = arith.constant dense<0.000000e+00> : vector<16xf32>
    %24 = vector.multi_reduction <add>, %23, %cst_9 [1] : vector<16x32xf32> to vector<16xf32>
    %25 = vector.shape_cast %24 : vector<16xf32> to vector<16x1xf32>
    %26 = math.log %25 : vector<16x1xf32>
    %27 = arith.subf %22, %12 : vector<16x32xf32>
    %28 = arith.mulf %23, %27 : vector<16x32xf32>
    %cst_10 = arith.constant dense<0.000000e+00> : vector<16xf32>
    %29 = vector.multi_reduction <add>, %28, %cst_10 [1] : vector<16x32xf32> to vector<16xf32>
    %30 = vector.shape_cast %29 : vector<16xf32> to vector<16x1xf32>
    %cst_11 = arith.constant 1.000000e+00 : f32
    %31 = vector.broadcast %cst_11 : f32 to vector<16x1xf32>
    %32 = arith.divf %31, %25 : vector<16x1xf32>
    %33 = arith.mulf %30, %32 : vector<16x1xf32>
    %34 = arith.subf %16, %26 : vector<16x1xf32>
    %35 = arith.addf %33, %34 : vector<16x1xf32>
    %cst_12 = arith.constant 0.000000e+00 : f32
    %36 = vector.broadcast %cst_12 : f32 to vector<16x1xf32>
    %37 = arith.select %8, %35, %36 : vector<16x1xi1>, vector<16x1xf32>
    %38 = vector.shape_cast %37 : vector<16x1xf32> to vector<1x16x1xf32>
    %cst_13 = arith.constant dense<0.000000e+00> : vector<1xf32>
    %39 = vector.multi_reduction <add>, %38, %cst_13 [1, 2] : vector<1x16x1xf32> to vector<1xf32>
    %40 = vector.shape_cast %39 : vector<1xf32> to vector<1x1x1xf32>
    %41 = vector.extract %40[0, 0, 0] : f32 from vector<1x1x1xf32>
    %42 = tpu.iota {dimensions = array<i32: 1>} : vector<16x32xi32>
    %43 = vector.broadcast %2 : vector<16x1xi32> to vector<16x32xi32>
    %44 = arith.cmpi eq, %42, %43 : vector<16x32xi32>
    %cst_14 = arith.constant 0.000000e+00 : f32
    %45 = vector.broadcast %cst_14 : f32 to vector<16x32xf32>
    %46 = arith.select %44, %12, %45 : vector<16x32xi1>, vector<16x32xf32>
    %cst_15 = arith.constant dense<0.000000e+00> : vector<16xf32>
    %47 = vector.multi_reduction <add>, %46, %cst_15 [1] : vector<16x32xf32> to vector<16xf32>
    %48 = vector.shape_cast %47 : vector<16xf32> to vector<16x1xf32>
    %49 = arith.subf %16, %48 : vector<16x1xf32>
    %c-100_i32 = arith.constant -100 : i32
    %50 = vector.broadcast %c-100_i32 : i32 to vector<16x1xi32>
    %51 = arith.cmpi ne, %2, %50 : vector<16x1xi32>
    %52 = arith.andi %8, %51 : vector<16x1xi1>
    %cst_16 = arith.constant 0.000000e+00 : f32
    %53 = vector.broadcast %cst_16 : f32 to vector<16x1xf32>
    %54 = arith.select %52, %49, %53 : vector<16x1xi1>, vector<16x1xf32>
    %55 = vector.shape_cast %54 : vector<16x1xf32> to vector<1x16x1xf32>
    %cst_17 = arith.constant dense<0.000000e+00> : vector<1xf32>
    %56 = vector.multi_reduction <add>, %55, %cst_17 [1, 2] : vector<1x16x1xf32> to vector<1xf32>
    %57 = vector.shape_cast %56 : vector<1xf32> to vector<1x1x1xf32>
    %58 = vector.extract %57[0, 0, 0] : f32 from vector<1x1x1xf32>
    %59 = arith.extui %52 : vector<16x1xi1> to vector<16x1xi32>
    %60 = arith.sitofp %59 : vector<16x1xi32> to vector<16x1xf32>
    %61 = vector.shape_cast %60 : vector<16x1xf32> to vector<1x16x1xf32>
    %cst_18 = arith.constant dense<0.000000e+00> : vector<1xf32>
    %62 = vector.multi_reduction <add>, %61, %cst_18 [1, 2] : vector<1x16x1xf32> to vector<1xf32>
    %63 = vector.shape_cast %62 : vector<1xf32> to vector<1x1x1xf32>
    %64 = vector.extract %63[0, 0, 0] : f32 from vector<1x1x1xf32>
    %65 = tpu.iota {dimensions = array<i32: 2>} : vector<1x8x128xi32>
    %c0_i32 = arith.constant 0 : i32
    %66 = vector.broadcast %c0_i32 : i32 to vector<1x8x128xi32>
    %67 = arith.cmpi eq, %65, %66 : vector<1x8x128xi32>
    %c1_i32 = arith.constant 1 : i32
    %68 = vector.broadcast %c1_i32 : i32 to vector<1x8x128xi32>
    %69 = arith.cmpi eq, %65, %68 : vector<1x8x128xi32>
    %c2_i32 = arith.constant 2 : i32
    %70 = vector.broadcast %c2_i32 : i32 to vector<1x8x128xi32>
    %71 = arith.cmpi eq, %65, %70 : vector<1x8x128xi32>
    %cst_19 = arith.constant 0.000000e+00 : f32
    %72 = vector.broadcast %64 : f32 to vector<1x8x128xf32>
    %73 = vector.broadcast %cst_19 : f32 to vector<1x8x128xf32>
    %74 = arith.select %71, %72, %73 : vector<1x8x128xi1>, vector<1x8x128xf32>
    %75 = vector.broadcast %41 : f32 to vector<1x8x128xf32>
    %76 = arith.select %69, %75, %74 : vector<1x8x128xi1>, vector<1x8x128xf32>
    %77 = vector.broadcast %58 : f32 to vector<1x8x128xf32>
    %78 = arith.select %67, %77, %76 : vector<1x8x128xi1>, vector<1x8x128xf32>
    %c0_20 = arith.constant 0 : index
    %c0_21 = arith.constant 0 : index
    %c0_22 = arith.constant 0 : index
    %79 = vector.load %arg4[%c0_20, %c0_21, %c0_22] : memref<1x8x128xf32, #tpu.memory_space<vmem>>, vector<1x8x128xf32>
    tpu.vector_store %arg4[%c0_20, %c0_21, %c0_22], %78 {strides = array<i32>} : memref<1x8x128xf32, #tpu.memory_space<vmem>>, vector<1x8x128xf32>,
    return
  }
  func.func @transform_0(%arg0: i32) -> (i32, i32) {
    %c0_i32 = arith.constant 0 : i32
    %c0_i32_0 = arith.constant 0 : i32
    return %arg0, %c0_i32 : i32, i32
  }
  func.func @transform_1(%arg0: i32) -> (i32, i32) {
    %c0_i32 = arith.constant 0 : i32
    %c0_i32_0 = arith.constant 0 : i32
    return %arg0, %c0_i32 : i32, i32
  }
  func.func @transform_2(%arg0: i32) -> (i32, i32) {
    %c0_i32 = arith.constant 0 : i32
    %c0_i32_0 = arith.constant 0 : i32
    return %arg0, %c0_i32 : i32, i32
  }
  func.func @transform_3(%arg0: i32) -> (i32, i32, i32) {
    %c0_i32 = arith.constant 0 : i32
    %c0_i32_0 = arith.constant 0 : i32
    %c0_i32_1 = arith.constant 0 : i32
    return %arg0, %c0_i32, %c0_i32_0 : i32, i32, i32
  }
}

</mosaic_0001>

<bundles_post_ra>
// kernel: tpu_custom_call.1
= control target key start
LH: loop header
LB: loop body
LE: loop exit
PB: predicated region body
PF: predicated region fallthrough
CT: control target
= control target key end

     0   :  { %8 = vsyncpa [#allocation3], 0  ;;  %s370_s0 = inlined_call_operand.vmem [shape: f32[16,32], index: 0, kind: input, shape index: {}]   ;;  %s371_s1 = inlined_call_operand.vmem [shape: s32[16,1], index: 1, kind: input, shape index: {}]   ;;  %s372_s2 = inlined_call_operand.hbm [shape: f32[16,32], index: 2, kind: input, shape index: {}]   ;;  %s373_s3 = inlined_call_operand.hbm [shape: f32[1,8,128], index: 3, kind: output, shape index: {}]  }
   0x1   :  { %9 = vsyncpa [#allocation4], 0  ;;  %s285_s12 = smov [#allocation2]  }
   0x2   :  { %s19_s13 = sshll.u32 %s285_s12, 4  ;;  %s20_s13 = int_to_ptr.vmem [resolvable:$true] %s19_s13 }
   0x3   :  { %s249_s14 = scalar_lea.vmem %s20_s13, 256  ;;  %p254_p1 = scmp.lt.s32.totalorder %s20_s13, %s20_s13 }
   0x4   :  { %p250_p0 = scmp.ne.s32.totalorder %s20_s13, %s249_s14  ;;  %p255_p2 = scmp.lt.s32.totalorder %s249_s14, %s249_s14 }
   0x6   :  { %p256_p3 = por %p255_p2, %p254_p1 }
   0x8   :  { %p257_p4 = pnand %p256_p3, %p250_p0 }
   0xa   :  { %260 = shalt.err (!%p257_p4)
}
   0xb   :  { %s286_s15 = smov 128   ;;  %s287_s16 = smov 8  }
   0xc   :  { %25 = dma.hbm_to_vmem [thread:$0]  %s372_s2, 256, %s20_s13, [#allocation3], %s286_s15, %s286_s15, %s287_s16  }
   0xd   :  { %281 = dma.done.wait [#allocation3], 256  }
   0xe   :  { %282 = vsyncadd [#allocation3], 4294967040  ;;  %v288_v0 = vmov 0   ;;  %vm44_vm0 = vcmask 261120   ;;  %v31_v1 = vld [vmem:[#allocation2] sm:$0xff]  ;;  %v32_v3 = vld [vmem:[#allocation2 + $0x8] sm:$0xff]  ;;  %v126_v26 = vlaneseq }
   0xf   :  { %220 = vset.pattern.permute.xlu1 %v288_v0  ;;  %219 = vset.pattern.permute.xlu0 %v288_v0  ;;  %v29_v2 = vld [vmem:[%s370_s0] sm:$0xff]  ;;  %v67_v4 = vsel %vm44_vm0, %v31_v1, -inf  ;;  %v30_v6 = vld [vmem:[%s370_s0 + $0x8] sm:$0xff]  ;;  %v70_v7 = vsel %vm44_vm0, %v32_v3, -inf  ;;  %vm113_vm5 = vcmask 7168   ;;  %v289_v47 = vmov 0.0  }
  0x10   :  { %v45_v5 = vsel %vm44_vm0, %v29_v2, -inf  ;;  %68 = vmax.xlane.f32.xlu0 %v67_v4  ;;  %v48_v8 = vsel %vm44_vm0, %v30_v6, -inf  ;;  %v327_v9 = vld [vmem:[%s371_s1 + $0x8] sm:$0xff]  ;;  %v333_v10 = vld [vmem:[%s371_s1] sm:$0xff]  ;;  %v338_v32 = vand.u32 127, %v126_v26  ;;  %s290_s27 = smov [#allocation5]  }
  0x11   :  { %46 = vmax.xlane.f32.xlu1 %v45_v5  ;;  %vm147_vm3 = vcmp.ne.s32.totalorder %v327_v9, 4294967196  ;;  %vm146_vm4 = vcmp.ne.s32.totalorder %v333_v10, 4294967196  ;;  %s196_s28 = sshll.u32 %s290_s27, 4  ;;  %s197_s28 = int_to_ptr.vmem [resolvable:$true] %s196_s28 }
  0x12   :  { %v205_v48 = vsel %vm146_vm4, 1.0, %v289_v47  ;;  %v206_v49 = vsel %vm147_vm3, 1.0, %v289_v47  ;;  %vm182_vm6 = vcmp.eq.s32.totalorder %v338_v32, 2  ;;  %vm181_vm7 = vcmp.eq.s32.totalorder %v338_v32, 1  ;;  %s261_s29 = scalar_lea.vmem %s197_s28, 128  ;;  %p266_p6 = scmp.lt.s32.totalorder %s197_s28, %s197_s28 }
  0x13   :  { %v168_v50 = vsel %vm113_vm5, %v205_v48, 0.0  ;;  %v169_v51 = vsel %vm113_vm5, %v206_v49, 0.0  ;;  %vm180_vm8 = vcmp.eq.s32.totalorder %v338_v32, 0  ;;  %p262_p5 = scmp.ne.s32.totalorder %s197_s28, %s261_s29  ;;  %p267_p7 = scmp.lt.s32.totalorder %s261_s29, %s261_s29 }
  0x14   :  { %71 = vmax.xlane.f32.xlu0 %v70_v7  ;;  %v170_v52 = vadd.f32 %v169_v51, %v168_v50 }
  0x15   :  { %49 = vmax.xlane.f32.xlu1 %v48_v8  ;;  %p268_p8 = por %p267_p7, %p266_p6 }
  0x17   :  { %p269_p9 = pnand %p268_p8, %p262_p5 }
  0x26   :  { %132 = vperm.xlu1 %220, %v327_v9  }
  0x2a   :  { %129 = vperm.xlu0 %219, %v333_v10  }
  0x99   :  { %v69_v11 = vpop.xlane.xlu0 %68 }
  0x9a   :  { %v47_v12 = vpop.xlane.xlu1 %46  ;;  %v73_v13 = vsub.f32 %v31_v1, %v69_v11 }
  0x9b   :  { %v51_v14 = vsub.f32 %v29_v2, %v47_v12 }
  0x9c   :  { %v75_v15 = vmul.f32 0.5, %v73_v13 }
  0x9d   :  { %v53_v16 = vmul.f32 1.442695, %v51_v14  ;;  %v72_v17 = vpop.xlane.xlu0 %71 }
  0x9e   :  { %v50_v18 = vpop.xlane.xlu1 %49  ;;  %v77_v19 = vmul.f32 1.442695, %v75_v15  ;;  %v74_v20 = vsub.f32 %v32_v3, %v72_v17  ;;  %v91_v37 = vsub.f32 %v75_v15, %v51_v14 }
  0x9f   :  { %221 = vpow2.f32 %v53_v16  ;;  %v52_v21 = vsub.f32 %v30_v6, %v50_v18 }
  0xa0   :  { %223 = vpow2.f32 %v77_v19  ;;  %v76_v22 = vmul.f32 0.5, %v74_v20 }
  0xa1   :  { %v55_v23 = vmul.f32 1.442695, %v52_v21 }
  0xa2   :  { %v79_v24 = vmul.f32 1.442695, %v76_v22  ;;  %v92_v40 = vsub.f32 %v76_v22, %v52_v21  ;;  %v133_v41 = vpop.permute.xlu1 %132 }
  0xa3   :  { %225 = vpow2.f32 %v55_v23  ;;  %vm135_vm2 = vcmp.eq.s32.totalorder %v338_v32, %v133_v41 }
  0xa4   :  { %227 = vpow2.f32 %v79_v24  ;;  %v137_v45 = vsel %vm135_vm2, %v52_v21, 0.0 }
  0xa5   :  { %v130_v31 = vpop.permute.xlu0 %129  ;;  %v141_v46 = vsel %vm44_vm0, %v137_v45, 0.0 }
  0xa6   :  { %vm134_vm1 = vcmp.eq.s32.totalorder %v338_v32, %v130_v31 }
  0xa7   :  { %v136_v36 = vsel %vm134_vm1, %v51_v14, 0.0 }
  0xa8   :  { %v138_v38 = vsel %vm44_vm0, %v136_v36, 0.0 }
  0xac   :  { %v222_v25 = vpop.eup %221 }
  0xad   :  { %v57_v27 = vsel %vm44_vm0, %v222_v25, 0.0  ;;  %v224_v28 = vpop.eup %223 }
  0xae   :  { %58 = vadd.xlane.f32.xlu1 %v57_v27  ;;  %v81_v29 = vsel %vm44_vm0, %v224_v28, 0.0  ;;  %v93_v39 = vmul.f32 %v224_v28, %v91_v37 }
  0xb0   :  { %v226_v30 = vpop.eup %225  ;;  %v95_v42 = vsel %vm44_vm0, %v93_v39, 0.0 }
  0xb1   :  { %v60_v33 = vsel %vm44_vm0, %v226_v30, 0.0  ;;  %v228_v34 = vpop.eup %227 }
  0xb2   :  { %82 = vadd.xlane.f32.xlu1 %v81_v29  ;;  %61 = vadd.xlane.f32.xlu0 %v60_v33  ;;  %v84_v35 = vsel %vm44_vm0, %v228_v34, 0.0  ;;  %v94_v43 = vmul.f32 %v228_v34, %v92_v40 }
  0xb4   :  { %v98_v44 = vsel %vm44_vm0, %v94_v43, 0.0 }
  0xb6   :  { %85 = vadd.xlane.f32.xlu1 %v84_v35 }
  0xba   :  { %139 = vadd.xlane.f32.xlu1 %v138_v38 }
  0xbe   :  { %96 = vadd.xlane.f32.xlu1 %v95_v42 }
  0xc2   :  { %99 = vadd.xlane.f32.xlu1 %v98_v44 }
  0xc6   :  { %142 = vadd.xlane.f32.xlu1 %v141_v46 }
 0x137   :  { %v59_v53 = vpop.xlane.xlu1 %58 }
 0x138   :  { %229 = vlog2.f32 %v59_v53 }
 0x13b   :  { %v83_v54 = vpop.xlane.xlu1 %82  ;;  %v62_v55 = vpop.xlane.xlu0 %61 }
 0x13c   :  { %231 = vlog2.f32 %v83_v54 }
 0x13d   :  { %233 = vrcp.f32 %v83_v54 }
 0x13e   :  { %235 = vlog2.f32 %v62_v55 }
 0x13f   :  { %v86_v56 = vpop.xlane.xlu1 %85 }
 0x140   :  { %237 = vlog2.f32 %v86_v56 }
 0x141   :  { %239 = vrcp.f32 %v86_v56 }
 0x143   :  { %v140_v57 = vpop.xlane.xlu1 %139 }
 0x145   :  { %v230_v58 = vpop.eup %229 }
 0x146   :  { %v64_v59 = vmul.f32 0.6931472, %v230_v58 }
 0x147   :  { %v97_v60 = vpop.xlane.xlu1 %96 }
 0x148   :  { %v144_v1 = vsub.f32 %v64_v59, %v140_v57 }
 0x149   :  { %v232_v61 = vpop.eup %231 }
 0x14a   :  { %v234_v62 = vpop.eup %233  ;;  %v88_v63 = vmul.f32 0.6931472, %v232_v61  ;;  %v150_v11 = vsel %vm146_vm4, %v144_v1, 0.0 }
 0x14b   :  { %v236_v0 = vpop.eup %235  ;;  %v100_v2 = vpop.xlane.xlu1 %99  ;;  %v105_v8 = vmul.f32 %v234_v62, %v97_v60  ;;  %v152_v19 = vsel %vm113_vm5, %v150_v11, 0.0 }
 0x14c   :  { %v66_v3 = vmul.f32 0.6931472, %v236_v0  ;;  %v107_v4 = vsub.f32 %v64_v59, %v88_v63 }
 0x14d   :  { %v238_v5 = vpop.eup %237 }
 0x14e   :  { %v240_v6 = vpop.eup %239  ;;  %v90_v7 = vmul.f32 0.6931472, %v238_v5  ;;  %v109_v13 = vadd.f32 %v107_v4, %v105_v8 }
 0x14f   :  { %v143_v12 = vpop.xlane.xlu1 %142  ;;  %v106_v15 = vmul.f32 %v240_v6, %v100_v2 }
 0x150   :  { %v108_v14 = vsub.f32 %v66_v3, %v90_v7  ;;  %v145_v16 = vsub.f32 %v66_v3, %v143_v12  ;;  %v114_v22 = vsel %vm113_vm5, %v109_v13, 0.0 }
 0x152   :  { %v110_v17 = vadd.f32 %v108_v14, %v106_v15  ;;  %v151_v18 = vsel %vm147_vm3, %v145_v16, 0.0 }
 0x153   :  { %v153_v20 = vsel %vm113_vm5, %v151_v18, 0.0 }
 0x154   :  { %v154_v21 = vadd.f32 %v153_v20, %v152_v19  ;;  %v115_v23 = vsel %vm113_vm5, %v110_v17, 0.0 }
 0x155   :  { %v116_v10 = vadd.f32 %v115_v23, %v114_v22 }
 0x156   :  { %155 = vadd.xlane.f32.xlu1 %v154_v21 }
 0x157   :  { %117 = vadd.xlane.f32.xlu0 %v116_v10 }
 0x15b   :  { %171 = vadd.xlane.f32.xlu0 %v170_v52 }
 0x1df   :  { %v156_v24 = vpop.xlane.xlu1 %155 }
 0x1e0   :  { %v157_v25 = vrot.slane %v156_v24, 4  ;;  %v118_v26 = vpop.xlane.xlu0 %117 }
 0x1e1   :  { %v119_v27 = vrot.slane %v118_v26, 4 }
 0x1e2   :  { %v158_v28 = vadd.f32 %v157_v25, %v156_v24 }
 0x1e3   :  { %v120_v9 = vadd.f32 %v119_v27, %v118_v26 }
 0x1e4   :  { %v159_v29 = vrot.slane %v158_v28, 2  ;;  %v172_v30 = vpop.xlane.xlu0 %171 }
 0x1e5   :  { %v121_v31 = vrot.slane %v120_v9, 2  ;;  %v173_v33 = vrot.slane %v172_v30, 4 }
 0x1e6   :  { %v160_v34 = vadd.f32 %v159_v29, %v158_v28 }
 0x1e7   :  { %v174_v35 = vadd.f32 %v173_v33, %v172_v30  ;;  %v122_v36 = vadd.f32 %v121_v31, %v120_v9 }
 0x1e8   :  { %v161_v37 = vrot.slane %v160_v34, 1 }
 0x1e9   :  { %v175_v38 = vrot.slane %v174_v35, 2  ;;  %v123_v39 = vrot.slane %v122_v36, 1 }
 0x1ea   :  { %v162_v40 = vadd.f32 %v161_v37, %v160_v34 }
 0x1eb   :  { %v176_v41 = vadd.f32 %v175_v38, %v174_v35  ;;  %v124_v42 = vadd.f32 %v123_v39, %v122_v36 }
 0x1ed   :  { %207 = vpush %v124_v42  ;;  %v177_v43 = vrot.slane %v176_v41, 1 }
 0x1ee   :  { %209 = vpush %v162_v40 }
 0x1ef   :  { %v178_v44 = vadd.f32 %v177_v43, %v176_v41 }
 0x1f1   :  { %211 = vpush %v178_v44 }
 0x21e   :  { %s208_s0 = spop %207 }
 0x21f   :  { %s210_s1 = spop %209  ;;  %v185_v46 = vstv %s208_s0 }
 0x220   :  { %v187_v48 = vstv %s210_s1 }
 0x222   :  { %s212_s26 = spop %211 }
 0x223   :  { %v183_v45 = vstv %s212_s26 }
 0x224   :  { %v184_v47 = vsel %vm182_vm6, %v183_v45, 0.0 }
 0x225   :  { %v186_v49 = vsel %vm181_vm7, %v185_v46, %v184_v47 }
 0x226   :  { %v188_v50 = vsel %vm180_vm8, %v187_v48, %v186_v49 }
 0x227   :  { %189 = vst [vmem:[#allocation5] sm:$0xff] %v188_v50 }
 0x228   :  { %272 = shalt.err (!%p269_p9)
}
 0x229   :  { %199 = dma.vmem_to_hbm [thread:$0]  %s197_s28, 128, %s373_s3, [#allocation4]  }
 0x22a   :  { %283 = dma.done.wait [#allocation4], 128  }
 0x22b   :  { %284 = vsyncadd [#allocation4], 4294967168 }
 0x22c   :  { %203 = vsyncpa [#allocation3], 1 }
 0x22d   :  { %204 = vsyncpa [#allocation4], 1 }

</bundles_post_ra>
